<compile_context>
chip_gen: v7x
topology: tpu7x:2x2x1
jax: 0.10.0
libtpu: 0.0.40
codegen_flags: <defaults>
</compile_context>

<pallas_src>
import jax
import jax.numpy as jnp
from jax.experimental import pallas as pl
from jax.experimental.pallas import tpu as pltpu

LANE = 128        # output last dim padded to a multiple of the 128-wide lane axis (at init)
TILE_ROWS = 16    # batch tiles are multiples of 16 sublanes (bf16 packs 16 rows per vreg)


def _round_up(n, m):
    return ((n + m - 1) // m) * m


def _actor_mlp_kernel(x_ref, w1_ref, b1_ref, w2_ref, b2_ref, w3_ref, b3_ref, out_ref):
    """Fused 3-layer MLP on one (TB, obs_dim) batch tile.

    h1 = relu(x @ W1 + b1)        # feature_extractor
    h2 = relu(h1 @ W2 + b2)       # net hidden layer
    logits = h2 @ W3 + b3         # net output layer (lane-padded columns)

    Matmuls run on the MXU in the weights' dtype (bf16) with f32 accumulation; bias add /
    ReLU stay in f32. The x tile arrives as f32 from HBM and is cast in-kernel (VPU slot).
    """
    cdt = w1_ref.dtype
    x = x_ref[...].astype(cdt)
    h1 = jnp.dot(x, w1_ref[...], preferred_element_type=jnp.float32) + b1_ref[...]
    h1 = jnp.maximum(h1, 0.0).astype(cdt)
    h2 = jnp.dot(h1, w2_ref[...], preferred_element_type=jnp.float32) + b2_ref[...]
    h2 = jnp.maximum(h2, 0.0).astype(cdt)
    logits = jnp.dot(h2, w3_ref[...], preferred_element_type=jnp.float32) + b3_ref[...]
    out_ref[...] = logits.astype(out_ref.dtype)


def mosac_discrete_actor_forward(x, params, action_dim, *, block_batch=1024):
    """Pallas forward: returns float32 logits of shape (batch, action_dim).

    params = (w1, b1, w2, b2, w3, b3) with weights stored (in, out) in the compute dtype
    (bf16), biases in f32, and the last layer zero-padded to a multiple of 128 output
    columns (see init_params).
    """
    w1, b1, w2, b2, w3, b3 = params
    batch, obs_dim = x.shape
    h1_dim = w1.shape[1]
    h2_dim = w2.shape[1]
    out_pad = w3.shape[1]
    assert out_pad % LANE == 0, "pad the output layer to a multiple of 128 columns at init"

    # Batch tiling: big tiles amortize the ~0.35us per-grid-step pipeline overhead, but cap
    # the tile so the "parallel" batch axis has >= 2 steps whenever batch allows it (keeps
    # both v7x TensorCores busy). Edge block may be partial; Pallas masks its store and no
    # cross-row reduction exists, so garbage padding rows never contaminate valid rows.
    tb = min(_round_up(block_batch, TILE_ROWS),
             _round_up(pl.cdiv(batch, 2), TILE_ROWS))
    grid = (pl.cdiv(batch, tb),)

    # x streams through the grid (double-buffered); weights/biases use a constant index_map
    # and are single-buffered so they stay VMEM-resident without duplicate buffers.
    def _const(shape):
        return pl.BlockSpec(shape, lambda i: (0, 0), pipeline_mode=pl.Buffered(1))

    in_specs = [
        pl.BlockSpec((tb, obs_dim), lambda i: (i, 0)),        # x tile (f32 in HBM)
        _const((obs_dim, h1_dim)), _const((1, h1_dim)),       # w1, b1
        _const((h1_dim, h2_dim)), _const((1, h2_dim)),        # w2, b2
        _const((h2_dim, out_pad)), _const((1, out_pad)),      # w3, b3 (lane-padded)
    ]
    out_specs = pl.BlockSpec((tb, out_pad), lambda i: (i, 0))

    param_bytes = sum(a.size * a.dtype.itemsize for a in (w1, b1, w2, b2, w3, b3))
    cost = pl.CostEstimate(
        flops=2 * batch * (obs_dim * h1_dim + h1_dim * h2_dim + h2_dim * out_pad),
        transcendentals=0,
        bytes_accessed=x.size * x.dtype.itemsize + param_bytes + batch * out_pad * 2,
    )

    logits = pl.pallas_call(
        _actor_mlp_kernel,
        # bf16 writeback halves the dominant lane-padded output HBM stream; upcast to f32
        # only after slicing below.
        out_shape=jax.ShapeDtypeStruct((batch, out_pad), jnp.bfloat16),
        grid=grid,
        in_specs=in_specs,
        out_specs=out_specs,
        compiler_params=pltpu.CompilerParams(
            # batch axis is embarrassingly parallel -> lets v7x shard it across its 2 TCs
            dimension_semantics=("parallel",),
            # tiny footprint (resident weights ~70 KiB + a few streamed tiles); 32 MiB
            # scoped limit is safe on v5e / v6e / v7x alike even at tb=2048
            vmem_limit_bytes=32 * 1024 * 1024,
        ),
        cost_estimate=cost,
    )(x, w1, b1, w2, b2, w3, b3)

    # Strip output-lane padding BEFORE any log_softmax / Categorical (padded logits would
    # alter the action distribution), then upcast to f32 for downstream numerics.
    return logits[:, :action_dim].astype(jnp.float32)


def init_params(key, obs_dim, net_arch, action_dim, *, compute_dtype=jnp.bfloat16):
    """Deterministic synthetic init (layer_init zeroes biases; weights just need determinism).

    Params are stored ONCE in the dtypes the kernel consumes (bf16 weights, f32 biases) so
    the per-call forward path has no convert ops. The output layer is zero-padded to a
    multiple of 128 columns so kernel stores are lane-dense; padded columns are inert.
    """
    k1, k2, k3 = jax.random.split(key, 3)
    h1, h2 = net_arch
    out_pad = _round_up(action_dim, LANE)
    w1 = jax.random.normal(k1, (obs_dim, h1), jnp.float32) * 0.1
    b1 = jnp.zeros((1, h1), jnp.float32)
    w2 = jax.random.normal(k2, (h1, h2), jnp.float32) * 0.1
    b2 = jnp.zeros((1, h2), jnp.float32)
    w3 = jnp.zeros((h2, out_pad), jnp.float32)
    w3 = w3.at[:, :action_dim].set(
        jax.random.normal(k3, (h2, action_dim), jnp.float32) * 0.1)
    b3 = jnp.zeros((1, out_pad), jnp.float32)
    return (w1.astype(compute_dtype), b1,
            w2.astype(compute_dtype), b2,
            w3.astype(compute_dtype), b3)


def reference_forward(x, params, action_dim):
    """Pure-JAX reference of MOSACDiscreteActor.forward mirroring the kernel's dtypes."""
    w1, b1, w2, b2, w3, b3 = params
    cdt = w1.dtype
    h1 = jnp.maximum(
        jnp.dot(x.astype(cdt), w1, preferred_element_type=jnp.float32) + b1, 0.0)
    h2 = jnp.maximum(
        jnp.dot(h1.astype(cdt), w2, preferred_element_type=jnp.float32) + b2, 0.0)
    logits = jnp.dot(h2.astype(cdt), w3, preferred_element_type=jnp.float32) + b3
    return logits[:, :action_dim]


if __name__ == "__main__":
    # Small shapes consistent with the module: 1-D observations, net_arch=[128, 128].
    batch = 20            # not a multiple of the tile: exercises the partial edge block
    obs_dim = 16
    net_arch = [128, 128]
    action_dim = 6

    key = jax.random.PRNGKey(0)
    kx, kp = jax.random.split(key)
    x = jax.random.normal(kx, (batch, obs_dim), jnp.float32)
    params = init_params(kp, obs_dim, net_arch, action_dim)

    # Default block_batch=1024 still yields a 2-step grid here (tile capped to keep >=2
    # parallel steps), so the multi-step + masked-edge paths are both exercised.
    logits = mosac_discrete_actor_forward(x, params, action_dim)
    logits = jax.block_until_ready(logits)

    ref = reference_forward(x, params, action_dim)
    assert logits.shape == (batch, action_dim)
    assert jnp.allclose(logits, ref, atol=2e-2, rtol=2e-2), "Pallas output mismatch vs reference"

    # get_action's Categorical sampling / log_softmax is cheap JAX post-processing glue on
    # the sliced logits; forward() (the logits) is what the kernel reproduces.
    print("KERNEL_OK")
</pallas_src>

<mosaic_0001>
module attributes {stable_mosaic.version = 11 : i64} {
  func.func @_actor_mlp_kernel(%arg0: i32, %arg1: memref<16x16xf32, #tpu.memory_space<vmem>>, %arg2: memref<16x128xbf16, #tpu.memory_space<vmem>>, %arg3: memref<1x128xf32, #tpu.memory_space<vmem>>, %arg4: memref<128x128xbf16, #tpu.memory_space<vmem>>, %arg5: memref<1x128xf32, #tpu.memory_space<vmem>>, %arg6: memref<128x128xbf16, #tpu.memory_space<vmem>>, %arg7: memref<1x128xf32, #tpu.memory_space<vmem>>, %arg8: memref<16x128xbf16, #tpu.memory_space<vmem>>) attributes {dimension_semantics = [#tpu.dimension_semantics<parallel>], iteration_bounds = array<i64: 2>, scalar_prefetch = 0 : i64, scratch_operands = 0 : i64, tpu.core_type = #tpu.core_type<tc>, window_params = [{transform_indices = @transform_0, window_bounds = array<i64: 16, 16>}, {pipeline_mode = #tpu.pipeline_mode<synchronous>, transform_indices = @transform_1, window_bounds = array<i64: 16, 128>}, {pipeline_mode = #tpu.pipeline_mode<synchronous>, transform_indices = @transform_2, window_bounds = array<i64: 1, 128>}, {pipeline_mode = #tpu.pipeline_mode<synchronous>, transform_indices = @transform_3, window_bounds = array<i64: 128, 128>}, {pipeline_mode = #tpu.pipeline_mode<synchronous>, transform_indices = @transform_4, window_bounds = array<i64: 1, 128>}, {pipeline_mode = #tpu.pipeline_mode<synchronous>, transform_indices = @transform_5, window_bounds = array<i64: 128, 128>}, {pipeline_mode = #tpu.pipeline_mode<synchronous>, transform_indices = @transform_6, window_bounds = array<i64: 1, 128>}, {transform_indices = @transform_7, window_bounds = array<i64: 16, 128>}]} {
    %c0 = arith.constant 0 : index
    %c0_0 = arith.constant 0 : index
    %0 = vector.load %arg1[%c0, %c0_0] : memref<16x16xf32, #tpu.memory_space<vmem>>, vector<16x16xf32>
    %1 = arith.truncf %0 : vector<16x16xf32> to vector<16x16xbf16>
    %c0_1 = arith.constant 0 : index
    %c0_2 = arith.constant 0 : index
    %2 = vector.load %arg2[%c0_1, %c0_2] : memref<16x128xbf16, #tpu.memory_space<vmem>>, vector<16x128xbf16>
    %cst = arith.constant dense<0.000000e+00> : vector<16x128xf32>
    %3 = tpu.matmul %1, %2, %cst {dimension_numbers = #tpu.dot_dimension_numbers<[1], [0], [0], [1], [0, 0, 1, 1], [], []>} : vector<16x16xbf16>, vector<16x128xbf16>, vector<16x128xf32> -> vector<16x128xf32>
    %c0_3 = arith.constant 0 : index
    %c0_4 = arith.constant 0 : index
    %4 = vector.load %arg3[%c0_3, %c0_4] : memref<1x128xf32, #tpu.memory_space<vmem>>, vector<1x128xf32>
    %5 = vector.broadcast %4 : vector<1x128xf32> to vector<16x128xf32>
    %6 = arith.addf %3, %5 : vector<16x128xf32>
    %cst_5 = arith.constant 0.000000e+00 : f32
    %7 = vector.broadcast %cst_5 : f32 to vector<16x128xf32>
    %8 = arith.maximumf %6, %7 : vector<16x128xf32>
    %9 = arith.truncf %8 : vector<16x128xf32> to vector<16x128xbf16>
    %c0_6 = arith.constant 0 : index
    %c0_7 = arith.constant 0 : index
    %10 = vector.load %arg4[%c0_6, %c0_7] : memref<128x128xbf16, #tpu.memory_space<vmem>>, vector<128x128xbf16>
    %cst_8 = arith.constant dense<0.000000e+00> : vector<16x128xf32>
    %11 = tpu.matmul %9, %10, %cst_8 {dimension_numbers = #tpu.dot_dimension_numbers<[1], [0], [0], [1], [0, 0, 1, 1], [], []>} : vector<16x128xbf16>, vector<128x128xbf16>, vector<16x128xf32> -> vector<16x128xf32>
    %c0_9 = arith.constant 0 : index
    %c0_10 = arith.constant 0 : index
    %12 = vector.load %arg5[%c0_9, %c0_10] : memref<1x128xf32, #tpu.memory_space<vmem>>, vector<1x128xf32>
    %13 = vector.broadcast %12 : vector<1x128xf32> to vector<16x128xf32>
    %14 = arith.addf %11, %13 : vector<16x128xf32>
    %cst_11 = arith.constant 0.000000e+00 : f32
    %15 = vector.broadcast %cst_11 : f32 to vector<16x128xf32>
    %16 = arith.maximumf %14, %15 : vector<16x128xf32>
    %17 = arith.truncf %16 : vector<16x128xf32> to vector<16x128xbf16>
    %c0_12 = arith.constant 0 : index
    %c0_13 = arith.constant 0 : index
    %18 = vector.load %arg6[%c0_12, %c0_13] : memref<128x128xbf16, #tpu.memory_space<vmem>>, vector<128x128xbf16>
    %cst_14 = arith.constant dense<0.000000e+00> : vector<16x128xf32>
    %19 = tpu.matmul %17, %18, %cst_14 {dimension_numbers = #tpu.dot_dimension_numbers<[1], [0], [0], [1], [0, 0, 1, 1], [], []>} : vector<16x128xbf16>, vector<128x128xbf16>, vector<16x128xf32> -> vector<16x128xf32>
    %c0_15 = arith.constant 0 : index
    %c0_16 = arith.constant 0 : index
    %20 = vector.load %arg7[%c0_15, %c0_16] : memref<1x128xf32, #tpu.memory_space<vmem>>, vector<1x128xf32>
    %21 = vector.broadcast %20 : vector<1x128xf32> to vector<16x128xf32>
    %22 = arith.addf %19, %21 : vector<16x128xf32>
    %23 = arith.truncf %22 : vector<16x128xf32> to vector<16x128xbf16>
    %c0_17 = arith.constant 0 : index
    %c0_18 = arith.constant 0 : index
    %24 = vector.load %arg8[%c0_17, %c0_18] : memref<16x128xbf16, #tpu.memory_space<vmem>>, vector<16x128xbf16>
    tpu.vector_store %arg8[%c0_17, %c0_18], %23 {strides = array<i32>} : memref<16x128xbf16, #tpu.memory_space<vmem>>, vector<16x128xbf16>,
    return
  }
  func.func @transform_0(%arg0: i32) -> (i32, i32) {
    %c0_i32 = arith.constant 0 : i32
    %c0_i32_0 = arith.constant 0 : i32
    return %arg0, %c0_i32 : i32, i32
  }
  func.func @transform_1(%arg0: i32) -> (i32, i32) {
    %c0_i32 = arith.constant 0 : i32
    %c0_i32_0 = arith.constant 0 : i32
    %c0_i32_1 = arith.constant 0 : i32
    return %c0_i32, %c0_i32_0 : i32, i32
  }
  func.func @transform_2(%arg0: i32) -> (i32, i32) {
    %c0_i32 = arith.constant 0 : i32
    %c0_i32_0 = arith.constant 0 : i32
    %c0_i32_1 = arith.constant 0 : i32
    return %c0_i32, %c0_i32_0 : i32, i32
  }
  func.func @transform_3(%arg0: i32) -> (i32, i32) {
    %c0_i32 = arith.constant 0 : i32
    %c0_i32_0 = arith.constant 0 : i32
    %c0_i32_1 = arith.constant 0 : i32
    return %c0_i32, %c0_i32_0 : i32, i32
  }
  func.func @transform_4(%arg0: i32) -> (i32, i32) {
    %c0_i32 = arith.constant 0 : i32
    %c0_i32_0 = arith.constant 0 : i32
    %c0_i32_1 = arith.constant 0 : i32
    return %c0_i32, %c0_i32_0 : i32, i32
  }
  func.func @transform_5(%arg0: i32) -> (i32, i32) {
    %c0_i32 = arith.constant 0 : i32
    %c0_i32_0 = arith.constant 0 : i32
    %c0_i32_1 = arith.constant 0 : i32
    return %c0_i32, %c0_i32_0 : i32, i32
  }
  func.func @transform_6(%arg0: i32) -> (i32, i32) {
    %c0_i32 = arith.constant 0 : i32
    %c0_i32_0 = arith.constant 0 : i32
    %c0_i32_1 = arith.constant 0 : i32
    return %c0_i32, %c0_i32_0 : i32, i32
  }
  func.func @transform_7(%arg0: i32) -> (i32, i32) {
    %c0_i32 = arith.constant 0 : i32
    %c0_i32_0 = arith.constant 0 : i32
    return %arg0, %c0_i32 : i32, i32
  }
}

</mosaic_0001>

<bundles_post_ra>
// kernel: tpu_custom_call.1
= control target key start
LH: loop header
LB: loop body
LE: loop exit
PB: predicated region body
PF: predicated region fallthrough
CT: control target
= control target key end

     0   :  { %12 = vsyncpa [#allocation3], 0  ;;  %s1342_s0 = inlined_call_operand.vmem [shape: f32[20,16], index: 0, kind: input, shape index: {}]   ;;  %s1343_s1 = inlined_call_operand.vmem [shape: bf16[16,128], index: 1, kind: input, shape index: {}]   ;;  %s1344_s2 = inlined_call_operand.vmem [shape: f32[1,128], index: 2, kind: input, shape index: {}]   ;;  %s1345_s3 = inlined_call_operand.hbm [shape: bf16[128,128], index: 3, kind: input, shape index: {}]   ;;  %s1346_s4 = inlined_call_operand.vmem [shape: f32[1,128], index: 4, kind: input, shape index: {}]   ;;  %s1347_s5 = inlined_call_operand.hbm [shape: bf16[128,128], index: 5, kind: input, shape index: {}]   ;;  %s1348_s6 = inlined_call_operand.vmem [shape: f32[1,128], index: 6, kind: input, shape index: {}]   ;;  %s1349_s7 = inlined_call_operand.hbm [shape: bf16[20,128], index: 7, kind: output, shape index: {}]  }
   0x1   :  { %13 = vsyncpa [#allocation6], 0 }
   0x2   :  { %14 = vsyncpa [#allocation4], 0 }
   0x3   :  { %16 = vsyncpa [#allocation4 + $0x1], 0  ;;  %s1118_s24 = smov 0   ;;  %s1120_s25 = smov 0  }
   0x4   :  { %s1122_s26 = smov 0   ;;  %s1124_s27 = smov 0  }
   0x5 LB: > { %s1139_s28 = sadd.s32 4294967295, %s1067_s27   ;;  %s742_s29 = sadd.s32 4294967294, %s1067_s27   ;;  %s1067_s27 = sphi %s1124_s27, %s1368_s27   ;;  %s1063_s26 = sphi %s1122_s26, %s1367_s26   ;;  %s1059_s25 = sphi %s1120_s25, %s1366_s25   ;;  %s1055_s24 = sphi %s1118_s24, %s1365_s24  }
   0x6   : > { %s1143_s30 = sadd.s32 1, %s1067_s27   ;;  %s181_s8 = sadd.s32 1, %s1063_s26 }
   0x7   : > { %s178_s9 = ssub.s32 %s1067_s27, %s1143_s30  ;;  %p191_p0 = scmp.ne.s32.totalorder %s1063_s26, %s1059_s25 }
   0x8   : > { %p179_p1 = scmp.eq.s32.totalorder %s178_s9, 0  ;;  %p192_p2 = scmp.eq.s32.totalorder %s1139_s28, 1 }
   0x9   : > { %p197_p3 = scmp.ne.s32.totalorder %s1059_s25, %s1055_s24  ;;  %p198_p4 = scmp.eq.s32.totalorder %s742_s29, 1 }
   0xa   : > { %s1154_s10 = scalar_select %p179_p1, %s1063_s26, %s181_s8  }
   0xb   : > { %p1156_p5 = por %p192_p2, %p191_p0  ;;  %p1160_p6 = por %p198_p4, %p197_p3 }
   0xc   : > { %1352 = sst [smem:[#allocation11_spill]] %s1154_s10  ;;  %p743_p7 = scmp.ge.s32.totalorder %s1067_s27, 1 }
   0xd   : > { %s1353_s11 = scalar_select %p1156_p5, 1, 0 }
   0xe   : > { %s1354_s12 = scalar_select %p1160_p6, 1, 0 }
   0xf   : > { %p205_p8 = scmp.lt.s32.totalorder %s1067_s27, 3  ;;  %p1350_p9 = scmp.eq.s32.totalorder %s1139_s28, 0 }
  0x10   : > { %s1069_s14 = smov [#allocation2]   ;;  %s1070_s17 = smov [#allocation5]  }
  0x11   : > { %p1167_p10 = pnand %p743_p7, %p205_p8  ;;  %s223_s15 = sshll.u32 %s1069_s14, 4  ;;  %s224_s15 = int_to_ptr.vmem [resolvable:$true] %s223_s15 }
  0x12   : > { %s239_s18 = sshll.u32 %s1070_s17, 4  ;;  %s941_s21 = scalar_lea.hbm %s1345_s3, 1024  ;;  %s1179_s18 = int_to_ptr.vmem [resolvable:$true] %s239_s18 }
  0x13   : > { %s1355_s13 = scalar_select %p1167_p10, 1, 0 }
  0x14   : > { %p868_p11 = pneg %p1167_p10  ;;  %p942_p13 = scmp.ne.s32.totalorder %s1345_s3, %s941_s21 }
  0x15   : > { %p948_p3 = scmp.lt.u32.totalorder %s941_s21, %s1345_s3 }
  0x16   : > { %p1175_p12 = pnand %p1350_p9, %p868_p11 }
  0x18   : > { %p943_p0 = pneg %p1175_p12 }
  0x1a   : > { %p944_p1 = pnand %p943_p0, %p942_p13 }
  0x1c   : > { %p945_p2 = pneg %p944_p1 }
  0x1e   : > { %p950_p4 = pnand %p948_p3, %p945_p2 }
  0x20   : > { %953 = shalt.err (!%p950_p4)
}
  0x21   : > { %s954_s9 = scalar_lea.vmem %s224_s15, 1024  ;;  %p962_p9 = scmp.lt.s32.totalorder %s224_s15, %s224_s15 }
  0x22   : > { %p955_p7 = scmp.ne.s32.totalorder %s224_s15, %s954_s9  ;;  %p963_p6 = scmp.lt.s32.totalorder %s954_s9, %s954_s9 }
  0x24   : > { %p957_p8 = pnand %p955_p7, %p943_p0  ;;  %p964_p5 = por %p963_p6, %p962_p9 }
  0x26   : > { %p958_p11 = pneg %p957_p8 }
  0x28   : > { %p965_p10 = pnand %p964_p5, %p958_p11 }
  0x2a   : > { %968 = shalt.err (!%p965_p10)
}
  0x2b   : > { %s1071_s14 = smov 64   ;;  %s1072_s17 = smov 4  }
  0x2c   : > { %871 = dma.hbm_to_vmem [thread:$0]  (!%p1175_p12), %s1345_s3, 1024, %s224_s15, [#allocation3], %s1071_s14, %s1071_s14, %s1072_s17  }
  0x2d   : > { %s969_s23 = scalar_lea.hbm %s1347_s5, 1024 }
  0x2e   : > { %p970_p13 = scmp.ne.s32.totalorder %s1347_s5, %s969_s23  ;;  %p976_p9 = scmp.lt.u32.totalorder %s969_s23, %s1347_s5 }
  0x30   : > { %p972_p5 = pnand %p970_p13, %p943_p0 }
  0x32   : > { %p973_p6 = pneg %p972_p5 }
  0x34   : > { %p978_p10 = pnand %p976_p9, %p973_p6 }
  0x36   : > { %981 = shalt.err (!%p978_p10)
}
  0x37   : > { %s982_s15 = scalar_lea.vmem %s1179_s18, 1024  ;;  %p990_p4 = scmp.lt.s32.totalorder %s1179_s18, %s1179_s18 }
  0x38   : > { %p983_p1 = scmp.ne.s32.totalorder %s1179_s18, %s982_s15  ;;  %p991_p7 = scmp.lt.s32.totalorder %s982_s15, %s982_s15 }
  0x3a   : > { %p985_p2 = pnand %p983_p1, %p943_p0  ;;  %p992_p8 = por %p991_p7, %p990_p4 }
  0x3c   : > { %p986_p3 = pneg %p985_p2 }
  0x3e   : > { %p993_p11 = pnand %p992_p8, %p986_p3 }
  0x40   : > { %996 = shalt.err (!%p993_p11)
}
  0x41   : > { %874 = dma.hbm_to_vmem [thread:$0]  (!%p1175_p12), %s1347_s5, 1024, %s1179_s18, [#allocation6], %s1071_s14, %s1071_s14, %s1072_s17  }
  0x42   : > { %p1357_p13 = scmp.ne.s32.totalorder %s1355_s13, 0 }
  0x43   : > { %p1358_p5 = scmp.eq.s32.totalorder (!%p1357_p13), %s1139_s28, 0 }
  0x44   : > { %275 = sbr.rel (%p1357_p13) target bundleno = 777 (0x309), region = 48 }
  0x4b   : > { %1042 = dma.done.wait (%p1358_p5), [#allocation3], 1024   ;;  %p1359_p0 = pmov %p1358_p5 }
  0x4d   : > { %1044 = vsyncadd (%p1359_p0), [#allocation3], 4294966272  ;;  %p1360_p6 = pmov %p1359_p0 }
  0x4e   : > { %p1361_p9 = pmov %p1359_p0 }
  0x4f   : > { %1046 = dma.done.wait (%p1360_p6), [#allocation6], 1024  }
  0x50   : > { %1048 = vsyncadd (%p1361_p9), [#allocation6], 4294966272  ;;  %s1239_s16 = sshll.u32 %s1139_s28, 1  ;;  %v1073_v0 = vmov 0.0   ;;  %vm1074_vm0 = vmmov 0   ;;  %v924_v1 = vld [vmem:[%s1343_s1] sm:$0xff]  }
  0x51   : > { %813 = vmatprep.subr.bf16.mxu0 %v1073_v0  ;;  %815 = vmatprep.mubr.msk.bf16.mxu0 %vm1074_vm0, %v1073_v0  ;;  %p320_p12 = scmp.lt.s32.totalorder %s1239_s16, 2  ;;  %vm353_vm1 = vcmask 130048   ;;  %v925_v5 = vld [vmem:[#allocation2] sm:$0xff]   ;;  %v926_v6 = vld [vmem:[#allocation2 + $0x8] sm:$0xff]   ;;  %v927_v7 = vld [vmem:[#allocation2 + $0x10] sm:$0xff]   ;;  %s312_s15 = sand.u32 1, %s1059_s25  }
  0x52   : > { %819 = vmatprep.subr.bf16.mxu1 %v1073_v0  ;;  %835 = vmatprep.mubr.msk.bf16.mxu1 %vm1074_vm0, %v1073_v0  ;;  %v928_v8 = vld [vmem:[#allocation2 + $0x18] sm:$0xff]   ;;  %v929_v9 = vld [vmem:[#allocation2 + $0x20] sm:$0xff]   ;;  %v930_v10 = vld [vmem:[#allocation2 + $0x28] sm:$0xff]   ;;  %s1282_s14 = scalar_lea.sflag [#allocation4], %s312_s15  ;;  %p1362_p10 = scmp.ne.s32.totalorder %s1353_s11, 0 }
  0x53   : > { %s321_s13 = scalar_select %p320_p12, %s1239_s16, 2  ;;  %814 = vmatpush3.bf16.msra.mxu0 %v924_v1  ;;  %820 = vmatpush3.bf16.msra.mxu1 %v925_v5  ;;  %v931_v11 = vld [vmem:[#allocation2 + $0x30] sm:$0xff]   ;;  %v932_v12 = vld [vmem:[#allocation2 + $0x38] sm:$0xff]   ;;  %v933_v13 = vld [vmem:[#allocation5] sm:$0xff]  }
  0x54   : > { %839 = vmatprep.subr.bf16.mxu0 %v1073_v0  ;;  %821 = vmatprep.subr.bf16.mxu1 %v1073_v0  ;;  %v934_v14 = vld [vmem:[#allocation5 + $0x8] sm:$0xff]   ;;  %v935_v15 = vld [vmem:[#allocation5 + $0x10] sm:$0xff]   ;;  %v936_v16 = vld [vmem:[#allocation5 + $0x18] sm:$0xff]   ;;  %s647_s17 = ssub.s32 (%p1362_p10), 3, %s1239_s16 }
  0x55   : > { %s752_s18 = sshll.u32 %s321_s13, 3  ;;  %v937_v17 = vld [vmem:[#allocation5 + $0x20] sm:$0xff]   ;;  %v938_v18 = vld [vmem:[#allocation5 + $0x28] sm:$0xff]   ;;  %v939_v29 = vld [vmem:[#allocation5 + $0x30] sm:$0xff]   ;;  %s750_s13 = sshll.u32 %s312_s15, 3 }
  0x56   : > { %s323_s20 = scalar_lea.vmem %s1342_s0, %s752_s18  ;;  %v753_v19 = vld [vmem:[%s1344_s2] ss:$0 sm:$0xff]  ;;  %v940_v30 = vld [vmem:[#allocation5 + $0x38] sm:$0xff]   ;;  %s314_s18 = scalar_lea.vmem [#allocation7], %s750_s13 }
  0x57   : > { %v335_v2 = vld [vmem:[%s323_s20] sm:$0xff]  ;;  %v336_v3 = vld [vmem:[%s323_s20 + $0x8] sm:$0xff]  ;;  %822 = vmatpush3.bf16.msra.mxu1 %v926_v6  ;;  %p648_p1 = scmp.lt.s32.totalorder (%p1362_p10), %s647_s17, 2 }
  0x58   : > { %v337_v4 = vpack.c.bf16 %v336_v3, %v335_v2  ;;  %823 = vmatprep.subr.bf16.mxu1 %v1073_v0  ;;  %v756_v31 = vld [vmem:[%s1346_s4] ss:$0 sm:$0xff] }
  0x59   : > { %v765_v41 = vld [vmem:[%s1348_s6] ss:$0 sm:$0xff] }
  0x5a   : > { %816 = vmatmul.mubr.msk.bf16.vlgmr.msra.gmra.mrb[0].mxu0 %vm353_vm1, %v337_v4 }
  0x5b   : > { %855 = vmatprep.mubr.msk.bf16.mxu0 %vm1074_vm0, %v1073_v0  ;;  %824 = vmatpush3.bf16.msra.mxu1 %v927_v7 }
  0x5c   : > { %825 = vmatprep.subr.bf16.mxu1 %v1073_v0  ;;  %840 = vmatpush3.bf16.msra.mxu0 %v933_v13 }
  0x5d   : > { %841 = vmatprep.subr.bf16.mxu0 %v1073_v0 }
  0x5f   : > { %826 = vmatpush3.bf16.msra.mxu1 %v928_v8 }
  0x60   : > { %827 = vmatprep.subr.bf16.mxu1 %v1073_v0  ;;  %842 = vmatpush3.bf16.msra.mxu0 %v934_v14 }
  0x61   : > { %843 = vmatprep.subr.bf16.mxu0 %v1073_v0 }
  0x63   : > { %828 = vmatpush3.bf16.msra.mxu1 %v929_v9 }
  0x64   : > { %829 = vmatprep.subr.bf16.mxu1 %v1073_v0  ;;  %844 = vmatpush3.bf16.msra.mxu0 %v935_v15 }
  0x65   : > { %845 = vmatprep.subr.bf16.mxu0 %v1073_v0 }
  0x67   : > { %830 = vmatpush3.bf16.msra.mxu1 %v930_v10 }
  0x68   : > { %831 = vmatprep.subr.bf16.mxu1 %v1073_v0  ;;  %846 = vmatpush3.bf16.msra.mxu0 %v936_v16 }
  0x69   : > { %847 = vmatprep.subr.bf16.mxu0 %v1073_v0 }
  0x6b   : > { %832 = vmatpush3.bf16.msra.mxu1 %v931_v11 }
  0x6c   : > { %833 = vmatprep.subr.bf16.mxu1 %v1073_v0  ;;  %848 = vmatpush3.bf16.msra.mxu0 %v937_v17 }
  0x6d   : > { %849 = vmatprep.subr.bf16.mxu0 %v1073_v0 }
  0x6f   : > { %834 = vmatpush3.bf16.msra.mxu1 %v932_v12 }
  0x70   : > { %850 = vmatpush3.bf16.msra.mxu0 %v938_v18 }
  0x71   : > { %851 = vmatprep.subr.bf16.mxu0 %v1073_v0 }
  0x74   : > { %852 = vmatpush3.bf16.msra.mxu0 %v939_v29 }
  0x75   : > { %853 = vmatprep.subr.bf16.mxu0 %v1073_v0 }
  0x78   : > { %854 = vmatpush3.bf16.msra.mxu0 %v940_v30 }
 0x12d   : > { %v391_v20 = vpop.f32.mrb[0].mxu0 }
 0x12e   : > { %v392_v21 = vadd.f32 %v753_v19, %v391_v20  ;;  %v817_v22 = vpop.f32.mrb[1].mxu0 }
 0x12f   : > { %v394_v23 = vpop.f32.mrb[2].mxu0 }
 0x130   : > { %v395_v24 = vadd.f32 %v753_v19, %v394_v23  ;;  %v818_v25 = vpop.f32.mrb[3].mxu0  ;;  %v398_v26 = vmax.f32 %v392_v21, 0.0 }
 0x132   : > { %v399_v27 = vmax.f32 %v395_v24, 0.0 }
 0x134   : > { %v400_v28 = vpack.c.bf16 %v399_v27, %v398_v26 }
 0x136   : > { %836 = vmatmul.mubr.bf16.vlgmr.msra.gmra.mrb[0].mxu1 %v400_v28 }
 0x209   : > { %v506_v32 = vpop.f32.mrb[0].mxu1 }
 0x20a   : > { %v507_v33 = vadd.f32 %v756_v31, %v506_v32  ;;  %v837_v34 = vpop.f32.mrb[1].mxu1 }
 0x20b   : > { %v509_v35 = vpop.f32.mrb[2].mxu1 }
 0x20c   : > { %v510_v36 = vadd.f32 %v756_v31, %v509_v35  ;;  %v838_v37 = vpop.f32.mrb[3].mxu1  ;;  %v513_v38 = vmax.f32 %v507_v33, 0.0 }
 0x20e   : > { %v514_v39 = vmax.f32 %v510_v36, 0.0 }
 0x210   : > { %v515_v40 = vpack.c.bf16 %v514_v39, %v513_v38 }
 0x212   : > { %856 = vmatmul.mubr.bf16.vlgmr.msra.gmra.mrb[4].mxu0 %v515_v40 }
 0x2e5   : > { %v621_v42 = vpop.f32.mrb[4].mxu0 }
 0x2e6   : > { %v857_v43 = vpop.f32.mrb[5].mxu0  ;;  %v622_v45 = vadd.f32 %v765_v41, %v621_v42  ;;  %645 = sbr.rel (!%p1362_p10) target bundleno = 777 (0x309), region = 60 }
 0x2e7   : > { %v624_v44 = vpop.f32.mrb[6].mxu0 }
 0x2e8   : > { %v625_v46 = vadd.f32 %v765_v41, %v624_v44  ;;  %v858_v47 = vpop.f32.mrb[7].mxu0 }
 0x2ea   : > { %v791_v48 = vpack.c.bf16 %v625_v46, %v622_v45 }
 0x2ec   : > { %792 = vst [vmem:[%s314_s18] sm:$0xff] %v791_v48  }
 0x2ed   : > { %s1370_s17 = smov (!%p648_p1, %s647_s17), 2 }
 0x2ee   : > { %s1287_s20 = sshll.u32 %s1370_s17, 6 }
 0x2ef   : > { %s652_s21 = ssub.s32 128, %s1287_s20 }
 0x2f0   : > { %653 = vsyncadd %s1282_s14, %s652_s21  ;;  %p779_p2 = scmp.ne.s32.totalorder %s1287_s20, 0  ;;  %s787_s22 = sshll.u32 %s1139_s28, 7 }
 0x2f1   : > { %s1296_s11 = scalar_lea.hbm %s1349_s7, %s787_s22  ;;  %s658_s8 = sshll.u32 %s314_s18, 4  ;;  %s1298_s8 = int_to_ptr.vmem [resolvable:$true] %s658_s8 }
 0x2f2   : > { %s997_s16 = scalar_lea.vmem %s1298_s8, %s1287_s20  ;;  %s1075_s9 = smov [#allocation7]  }
 0x2f3   : > { %p998_p3 = scmp.ne.s32.totalorder %s1298_s8, %s997_s16  ;;  %s1001_s15 = sshll.u32 %s1075_s9, 4  ;;  %s1002_s15 = int_to_ptr.vmem [resolvable:$false] %s1001_s15 }
 0x2f4   : > { %s1003_s28 = scalar_lea.vmem %s1002_s15, 256  ;;  %p1004_p8 = scmp.lt.s32.totalorder %s1298_s8, %s1002_s15 }
 0x2f5   : > { %p999_p4 = pnand %p998_p3, %p779_p2  ;;  %p1005_p11 = scmp.lt.s32.totalorder %s1003_s28, %s997_s16 }
 0x2f7   : > { %p1000_p7 = pneg %p999_p4  ;;  %p1006_p13 = por %p1005_p11, %p1004_p8 }
 0x2f9   : > { %p1007_p5 = pnand %p1006_p13, %p1000_p7 }
 0x2fb   : > { %1010 = shalt.err (!%p1007_p5)
}
 0x2fc   : > { %s1011_s10 = scalar_lea.hbm %s1296_s11, %s1287_s20  ;;  %s1015_s18 = scalar_lea.hbm %s1349_s7, 192 }
 0x2fd   : > { %p1012_p0 = scmp.ne.s32.totalorder %s1296_s11, %s1011_s10  ;;  %p1016_p12 = scmp.lt.u32.totalorder %s1296_s11, %s1349_s7 }
 0x2fe   : > { %p1017_p10 = scmp.lt.u32.totalorder %s1015_s18, %s1011_s10  ;;  %p1019_p3 = scmp.lt.u32.totalorder %s1011_s10, %s1296_s11 }
 0x2ff   : > { %p1013_p6 = pnand %p1012_p0, %p779_p2 }
 0x300   : > { %p1018_p1 = por %p1017_p10, %p1016_p12 }
 0x301   : > { %p1014_p9 = pneg %p1013_p6 }
 0x302   : > { %p1020_p4 = por %p1019_p3, %p1018_p1 }
 0x304   : > { %p1021_p7 = pnand %p1020_p4, %p1014_p9 }
 0x306   : > { %1024 = shalt.err (!%p1021_p7)
}
 0x307   : > { %s1076_s22 = smov 64   ;;  %s1077_s23 = smov 4  }
 0x308   : > { %664 = dma.vmem_to_hbm [thread:$0]  (%p779_p2), %s1298_s8, %s1287_s20, %s1296_s11, %s1282_s14, %s1076_s22, %s1076_s22, %s1077_s23  }
 0x309 PF: > { %p883_p8 = scmp.ge.s32.totalorder %s1067_s27, 2  ;;  %s673_s29 = sand.u32 1, %s1055_s24  }
 0x30a   : > { %p1363_p11 = scmp.ne.s32.totalorder %s1354_s12, 0  ;;  %s674_s16 = scalar_lea.sflag [#allocation4], %s673_s29 }
 0x30c   : > { %p876_p13 = pnand %p883_p8, %p1363_p11 }
 0x30e   : > { %1050 = dma.done.wait (!%p876_p13), %s674_s16, 128  }
 0x30f   : > { %1052 = vsyncadd (!%p876_p13), %s674_s16, 4294967168  ;;  %s1364_s9 = sld [smem:[#allocation11_spill]]  ;;  %p19_p5 = scmp.ge.s32.totalorder %s1143_s30, 4  }
 0x310   : > { %s1365_s24 = smov %s1059_s25  ;;  %s1366_s25 = smov %s1063_s26 }
 0x311   : > { %s1368_s27 = smov %s1143_s30  ;;  %21 = sbr.rel (!%p19_p5) target bundleno = 5 (0x5), region = 92 }
 0x315   : > { %s1367_s26 = smov %s1364_s9 }
 0x318   :  { %679 = vsyncpa [#allocation3], 1 }
 0x319   :  { %681 = vsyncpa [#allocation3 + $0x1], 1 }
 0x31a   :  { %682 = vsyncpa [#allocation6], 1 }
 0x31b   :  { %683 = vsyncpa [#allocation4], 1 }
 0x31c   :  { %685 = vsyncpa [#allocation4 + $0x1], 1 }

</bundles_post_ra>
